<compile_context>
chip_gen: v5e
topology: v5e:2x2
jax: 0.10.0
libtpu: 0.0.40
codegen_flags: <defaults>
</compile_context>

<pallas_src>
import functools

import numpy as np
import jax
import jax.numpy as jnp
from jax.experimental import pallas as pl
from jax.experimental.pallas import tpu as pltpu

TEMP = 100.0


def bnn_kernel(data_ref, param_ref, out_ref, *, n_features, hidden_dim,
               num_particles, seg_row):
    F_, H, P = n_features, hidden_dim, num_particles
    B = data_ref.shape[0]

    # --- parameter slab (static sublane slices); theta' = 2*theta - 1 -------
    w1b1 = 2.0 * param_ref[:F_ + 1, :] - 1.0            # (F+1, P*H) w1 + b1 row
    w2_row = 2.0 * param_ref[F_ + 1:F_ + 2, :] - 1.0    # (1, P*H)
    b2_rep = (2.0 * param_ref[F_ + 2:F_ + 3, :] - 1.0) * (1.0 / H)  # (1, P*H)
    seg_t = param_ref[seg_row:seg_row + P, :]           # (P, P*H) constant 0/1

    # --- data slab -----------------------------------------------------------
    x_aug = data_ref[:, :F_ + 1]                        # (B, F+1) = [X | 1]
    y = data_ref[:, F_ + 1:F_ + 2]                      # (B, 1)

    # Hidden layer for ALL particles at once; the ones column picks up b1.
    hidden = jnp.tanh(
        jnp.dot(x_aug, w1b1, preferred_element_type=jnp.float32))   # (B, P*H)

    # Second layer: elementwise scale by w2 (plus b2/H per lane), then a
    # segment-sum over each particle's H lanes via one lane-dense contraction
    # against the constant 0/1 segment matrix.
    prod = hidden * w2_row + b2_rep                                  # (B, P*H)
    logit = jax.lax.dot_general(
        prod, seg_t,
        dimension_numbers=(((1,), (1,)), ((), ())),
        preferred_element_type=jnp.float32)                          # (B, P)

    out = jax.nn.sigmoid(logit)                                      # (B, P)
    diff = out - y                                                   # (B, P)
    mse = jnp.sum(diff * diff, axis=0, keepdims=True) * (1.0 / B)    # (1, P)
    out_ref[...] = -TEMP * mse                                       # (1, P)


def bayesian_nn_forward(theta, X_batch, y_batch, n_features, hidden_dim):
    """log_p per particle, matching BayesianNN.forward for a fixed minibatch."""
    P, D = theta.shape
    B = X_batch.shape[0]
    F_, H = n_features, hidden_dim
    PH = P * H
    assert D == (F_ + 2) * H + 1
    f32 = jnp.float32

    # ---- pure layout glue: fold particles into the lane dim, pack 2 slabs ---
    # lane index = p*H + h everywhere below (consistent across all rows).
    w1_rows = jnp.transpose(
        theta[:, :F_ * H].reshape(P, F_, H), (1, 0, 2)).reshape(F_, PH)
    b1_row = theta[:, F_ * H:(F_ + 1) * H].reshape(1, PH)
    w2_row = theta[:, (F_ + 1) * H:(F_ + 2) * H].reshape(1, PH)
    b2_rep = jnp.repeat(theta[:, D - 1:D], H, axis=1).reshape(1, PH)

    head = F_ + 3
    seg_row = ((head + 7) // 8) * 8            # align seg rows to a sublane tile
    pad = jnp.zeros((seg_row - head, PH), f32)
    # Constant 0/1 segment matrix built with numpy at trace time (no in-kernel
    # iota/compare/select):  seg_t[p, p*H + h] = 1.
    seg_t = jnp.asarray(
        (np.arange(PH)[None, :] // H) == np.arange(P)[:, None], dtype=f32)

    param_slab = jnp.concatenate(
        [w1_rows, b1_row, w2_row, b2_rep, pad, seg_t], axis=0)  # (seg_row+P, PH)
    data_slab = jnp.concatenate(
        [X_batch.astype(f32), jnp.ones((B, 1), f32),
         y_batch.reshape(B, 1).astype(f32)], axis=1)            # (B, F+2)

    vmem = lambda: pl.BlockSpec(memory_space=pltpu.MemorySpace.VMEM)
    out = pl.pallas_call(
        functools.partial(bnn_kernel, n_features=F_, hidden_dim=H,
                          num_particles=P, seg_row=seg_row),
        out_shape=jax.ShapeDtypeStruct((1, P), f32),
        in_specs=[vmem(), vmem()],
        out_specs=vmem(),
    )(data_slab, param_slab)
    return out.reshape(P)


def reference_forward(theta, X, y, n_features, hidden_dim):
    """Pure-JAX reference mirroring the PyTorch module exactly."""
    F_, H = n_features, hidden_dim
    P = theta.shape[0]
    th = 2.0 * theta - 1.0
    w1 = th[:, :F_ * H].reshape(P, F_, H)
    b1 = th[:, F_ * H:(F_ + 1) * H][:, None, :]
    w2 = th[:, (F_ + 1) * H:(F_ + 2) * H][:, :, None]
    b2 = th[:, -1].reshape(P, 1, 1)
    inp = jnp.broadcast_to(X[None], (P,) + X.shape)
    inter = jnp.tanh(
        jnp.einsum('pbf,pfh->pbh', inp, w1,
                   precision=jax.lax.Precision.HIGHEST) + b1)
    out_logit = jnp.einsum('pbh,pho->pbo', inter, w2,
                           precision=jax.lax.Precision.HIGHEST) + b2
    out = jax.nn.sigmoid(out_logit[..., 0])
    log_p = -jnp.mean((out - y[None]) ** 2, axis=1) * TEMP
    return log_p


if __name__ == "__main__":
    # Small deterministic setup consistent with the module:
    #   n_features=4, hidden_dim=32, batch_size=8, num_particles=4
    n_train = 64
    n_features = 4
    hidden_dim = 32
    batch_size = 8
    num_particles = 4
    D = (n_features + 2) * hidden_dim + 1  # 193

    key = jax.random.PRNGKey(0)
    k_x, k_y, k_theta, k_idx = jax.random.split(key, 4)

    X_train = jax.random.normal(k_x, (n_train, n_features), dtype=jnp.float32)
    y_train = (jax.random.uniform(k_y, (n_train,)) > 0.5).astype(jnp.float32)
    theta = jax.random.uniform(k_theta, (num_particles, D), dtype=jnp.float32)

    # The PyTorch module draws a random minibatch via random.sample; here the
    # batch selection is made deterministic via a PRNG key (host-side).
    idx = jax.random.choice(k_idx, n_train, (batch_size,), replace=False)
    X_batch = X_train[idx]
    y_batch = y_train[idx]

    forward_fn = jax.jit(bayesian_nn_forward, static_argnums=(3, 4))
    log_p = forward_fn(theta, X_batch, y_batch, n_features, hidden_dim)
    log_p = jax.block_until_ready(log_p)

    ref = reference_forward(theta, X_batch, y_batch, n_features, hidden_dim)
    ref = jax.block_until_ready(ref)

    assert log_p.shape == (num_particles,)
    assert jnp.allclose(log_p, ref, rtol=1e-3, atol=1e-2), (log_p, ref)
    print("KERNEL_OK")
</pallas_src>

<mosaic_0001>
module attributes {stable_mosaic.version = 11 : i64} {
  func.func @bnn_kernel(%arg0: memref<8x6xf32, #tpu.memory_space<vmem>>, %arg1: memref<12x128xf32, #tpu.memory_space<vmem>>, %arg2: memref<1x4xf32, #tpu.memory_space<vmem>>) attributes {dimension_semantics = [], scalar_prefetch = 0 : i64, scratch_operands = 0 : i64, tpu.core_type = #tpu.core_type<tc>} {
    %c0 = arith.constant 0 : index
    %c0_0 = arith.constant 0 : index
    %0 = vector.load %arg1[%c0, %c0_0] : memref<12x128xf32, #tpu.memory_space<vmem>>, vector<5x128xf32>
    %cst = arith.constant 2.000000e+00 : f32
    %1 = vector.broadcast %cst : f32 to vector<5x128xf32>
    %2 = arith.mulf %1, %0 : vector<5x128xf32>
    %cst_1 = arith.constant 1.000000e+00 : f32
    %3 = vector.broadcast %cst_1 : f32 to vector<5x128xf32>
    %4 = arith.subf %2, %3 : vector<5x128xf32>
    %c5 = arith.constant 5 : index
    %c0_2 = arith.constant 0 : index
    %5 = vector.load %arg1[%c5, %c0_2] : memref<12x128xf32, #tpu.memory_space<vmem>>, vector<1x128xf32>
    %cst_3 = arith.constant 2.000000e+00 : f32
    %6 = vector.broadcast %cst_3 : f32 to vector<1x128xf32>
    %7 = arith.mulf %6, %5 : vector<1x128xf32>
    %cst_4 = arith.constant 1.000000e+00 : f32
    %8 = vector.broadcast %cst_4 : f32 to vector<1x128xf32>
    %9 = arith.subf %7, %8 : vector<1x128xf32>
    %c6 = arith.constant 6 : index
    %c0_5 = arith.constant 0 : index
    %10 = vector.load %arg1[%c6, %c0_5] : memref<12x128xf32, #tpu.memory_space<vmem>>, vector<1x128xf32>
    %cst_6 = arith.constant 2.000000e+00 : f32
    %11 = vector.broadcast %cst_6 : f32 to vector<1x128xf32>
    %12 = arith.mulf %11, %10 : vector<1x128xf32>
    %cst_7 = arith.constant 1.000000e+00 : f32
    %13 = vector.broadcast %cst_7 : f32 to vector<1x128xf32>
    %14 = arith.subf %12, %13 : vector<1x128xf32>
    %cst_8 = arith.constant 3.125000e-02 : f32
    %15 = vector.broadcast %cst_8 : f32 to vector<1x128xf32>
    %16 = arith.mulf %14, %15 : vector<1x128xf32>
    %c8 = arith.constant 8 : index
    %c0_9 = arith.constant 0 : index
    %17 = vector.load %arg1[%c8, %c0_9] : memref<12x128xf32, #tpu.memory_space<vmem>>, vector<4x128xf32>
    %c0_10 = arith.constant 0 : index
    %c0_11 = arith.constant 0 : index
    %18 = vector.load %arg0[%c0_10, %c0_11] : memref<8x6xf32, #tpu.memory_space<vmem>>, vector<8x5xf32>
    %c0_12 = arith.constant 0 : index
    %c5_13 = arith.constant 5 : index
    %19 = vector.load %arg0[%c0_12, %c5_13] : memref<8x6xf32, #tpu.memory_space<vmem>>, vector<8x1xf32>
    %cst_14 = arith.constant dense<0.000000e+00> : vector<8x128xf32>
    %20 = tpu.matmul %18, %4, %cst_14 {dimension_numbers = #tpu.dot_dimension_numbers<[1], [0], [0], [1], [0, 0, 1, 1], [], []>} : vector<8x5xf32>, vector<5x128xf32>, vector<8x128xf32> -> vector<8x128xf32>
    %21 = math.tanh %20 : vector<8x128xf32>
    %22 = vector.broadcast %9 : vector<1x128xf32> to vector<8x128xf32>
    %23 = arith.mulf %21, %22 : vector<8x128xf32>
    %24 = vector.broadcast %16 : vector<1x128xf32> to vector<8x128xf32>
    %25 = arith.addf %23, %24 : vector<8x128xf32>
    %cst_15 = arith.constant dense<0.000000e+00> : vector<8x4xf32>
    %26 = tpu.matmul %25, %17, %cst_15 {dimension_numbers = #tpu.dot_dimension_numbers<[1], [1], [0], [0], [0, 0, 1, 0], [], []>} : vector<8x128xf32>, vector<4x128xf32>, vector<8x4xf32> -> vector<8x4xf32>
    %27 = arith.negf %26 : vector<8x4xf32>
    %28 = math.exp %27 : vector<8x4xf32>
    %cst_16 = arith.constant 1.000000e+00 : f32
    %29 = vector.broadcast %cst_16 : f32 to vector<8x4xf32>
    %30 = arith.addf %29, %28 : vector<8x4xf32>
    %31 = arith.divf %29, %30 : vector<8x4xf32>
    %32 = vector.broadcast %19 : vector<8x1xf32> to vector<8x4xf32>
    %33 = arith.subf %31, %32 : vector<8x4xf32>
    %34 = arith.mulf %33, %33 : vector<8x4xf32>
    %cst_17 = arith.constant dense<0.000000e+00> : vector<4xf32>
    %35 = vector.multi_reduction <add>, %34, %cst_17 [0] : vector<8x4xf32> to vector<4xf32>
    %36 = vector.shape_cast %35 : vector<4xf32> to vector<1x4xf32>
    %cst_18 = arith.constant 1.250000e-01 : f32
    %37 = vector.broadcast %cst_18 : f32 to vector<1x4xf32>
    %38 = arith.mulf %36, %37 : vector<1x4xf32>
    %cst_19 = arith.constant -1.000000e+02 : f32
    %39 = vector.broadcast %cst_19 : f32 to vector<1x4xf32>
    %40 = arith.mulf %39, %38 : vector<1x4xf32>
    %c0_20 = arith.constant 0 : index
    %c0_21 = arith.constant 0 : index
    %41 = vector.load %arg2[%c0_20, %c0_21] : memref<1x4xf32, #tpu.memory_space<vmem>>, vector<1x4xf32>
    tpu.vector_store %arg2[%c0_20, %c0_21], %40 {strides = array<i32>} : memref<1x4xf32, #tpu.memory_space<vmem>>, vector<1x4xf32>,
    return
  }
}

</mosaic_0001>

<bundles_post_ra>
// kernel: bayesian_nn_forward.1
= control target key start
LH: loop header
LB: loop body
LE: loop exit
PB: predicated region body
PF: predicated region fallthrough
CT: control target
= control target key end

     0   :  { %s206_s0 = inlined_call_operand.vmem [shape: f32[8,6], index: 0, kind: input, shape index: {}]   ;;  %s207_s1 = inlined_call_operand.vmem [shape: f32[12,128], index: 1, kind: input, shape index: {}]   ;;  %s208_s2 = inlined_call_operand.hbm [shape: f32[1,4], index: 2, kind: output, shape index: {}]  }
   0x1   :  { %v12_v0 = vld [vmem:[%s207_s1] sm:$0x1f] }
   0x2   :  { %v13_v1 = vmul.f32 2.0, %v12_v0 }
   0x3   :  { %7 = vsyncpa [#allocation3], 0  ;;  %vm28_vm0 = vcmask 1044480   ;;  %v23_v3 = vld [vmem:[%s206_s0] sm:$0xff]  ;;  %vm24_vm1 = vcmask 39936   ;;  %v171_v5 = vmov 5  }
   0x4   :  { %v130_v2 = vadd.f32 -1.0, %v13_v1  ;;  %v22_v4 = vld [vmem:[%s207_s1 + $0x8] sm:$0xf]  ;;  %138 = vset.pattern.permute.xlu0 %v171_v5  ;;  %v18_v6 = vld [vmem:[%s207_s1 + $0x6] sm:$0x1]  ;;  %vm102_vm6 = vcmask 31744  }
   0x5   :  { %72 = vmatpush.xpose.msra.mxu1 %v22_v4  ;;  %97 = vperm.xlu0 %138, %v23_v3   ;;  %v15_v7 = vld [vmem:[%s207_s1 + $0x5] sm:$0x1]  ;;  %v19_v8 = vmul.f32 2.0, %v18_v6  ;;  %s172_s0 = smov [#allocation2]   ;;  %s121_s21 = sshll.u32 %s208_s2, 4  ;;  %vm112_vm7 = vcmask 24576   ;;  %s122_s21 = int_to_ptr.hbm [resolvable:$true] %s121_s21 }
   0x6   :  { %133 = vmatpush.msk.msra.mxu0 %vm28_vm0, %v130_v2  ;;  %v16_v9 = vmul.f32 2.0, %v15_v7  ;;  %s119_s1 = sshll.u32 %s172_s0, 4  ;;  %s120_s1 = int_to_ptr.vmem [resolvable:$true] %s119_s1 }
   0x7   :  { %134 = vmatmul.msk.f32.vlgmr.msra.gmra.mxu0 %vm24_vm1, %v23_v3  ;;  %v132_v10 = vadd.f32 -1.0, %v19_v8 }
   0x8   :  { %v131_v12 = vadd.f32 -1.0, %v16_v9 }
   0x9   :  { %v21_v13 = vmul.f32 0.03125, %v132_v10 }
   0xa   :  { %v53_v14 = vperm.slane %v131_v12, 0 }
   0xb   :  { %v55_v15 = vperm.slane %v21_v13, 0 }
  0x77   :  { %v98_v30 = vpop.permute.xlu0 %97 }
  0x84   :  { %v49_v11 = vpop.f32.mrf.mxu0 }
  0x85   :  { %139 = vtanh.f32 %v49_v11 }
  0x8b   :  { %v140_v16 = vpop.eup %139 }
  0x8c   :  { %v54_v17 = vmul.f32 %v140_v16, %v53_v14 }
  0x8e   :  { %v56_v18 = vadd.f32 %v55_v15, %v54_v17 }
  0x90   :  { %73 = vmatmul.f32.vlgmr.msra.gmra.mxu1 %v56_v18 }
 0x10d   :  { %v74_v19 = vpop.f32.mrf.mxu1 }
 0x10e   :  { %v135_v20 = vmul.f32 -1.442695, %v74_v19 }
 0x110   :  { %141 = vpow2.f32 %v135_v20 }
 0x116   :  { %v142_v21 = vpop.eup %141 }
 0x117   :  { %v80_v22 = vadd.f32 1.0, %v142_v21 }
 0x119   :  { %143 = vrcp.f32 %v80_v22  ;;  %v92_v26 = vand.u32 2147483648, %v80_v22  ;;  %v90_v28 = vand.u32 2147483647, %v80_v22  ;;  %vm86_vm3 = vweird.f32 %v80_v22 }
 0x11b   :  { %v93_v31 = vor.u32 1.1754944e-38, %v92_v26  ;;  %vm91_vm5 = vcmp.eq.f32.partialorder %v90_v28, 8.507059e+37 }
 0x11f   :  { %v144_v23 = vpop.eup %143 }
 0x120   :  { %v82_v24 = vmul.f32 %v144_v23, %v80_v22  ;;  %vm87_vm2 = vweird.f32 %v144_v23 }
 0x121   :  { %vm88_vm4 = vmor %vm86_vm3, %vm87_vm2 }
 0x122   :  { %v83_v25 = vsub.f32 1.0, %v82_v24 }
 0x124   :  { %v84_v27 = vmul.f32 %v144_v23, %v83_v25 }
 0x126   :  { %v85_v29 = vadd.f32 %v144_v23, %v84_v27 }
 0x128   :  { %v89_v32 = vsel %vm88_vm4, %v144_v23, %v85_v29 }
 0x129   :  { %v94_v33 = vsel %vm91_vm5, %v93_v31, %v89_v32 }
 0x12a   :  { %v100_v34 = vsub.f32 %v94_v33, %v98_v30 }
 0x12c   :  { %v101_v35 = vmul.f32 %v100_v34, %v100_v34 }
 0x12e   :  { %v103_v36 = vsel %vm102_vm6, %v101_v35, 0.0 }
 0x12f   :  { %v104_v37 = vrot.slane %v103_v36, 4 }
 0x131   :  { %v105_v38 = vadd.f32 %v104_v37, %v103_v36 }
 0x133   :  { %v106_v39 = vrot.slane %v105_v38, 2 }
 0x135   :  { %v107_v40 = vadd.f32 %v106_v39, %v105_v38 }
 0x137   :  { %v108_v41 = vrot.slane %v107_v40, 1 }
 0x139   :  { %v109_v42 = vadd.f32 %v108_v41, %v107_v40 }
 0x13b   :  { %v110_v43 = vmul.f32 0.125, %v109_v42 }
 0x13d   :  { %v111_v44 = vmul.f32 -100.0, %v110_v43 }
 0x13f   :  { %113 = vst.msk [vmem:[#allocation2] sm:$0x1] %vm112_vm7, %v111_v44 }
 0x140   :  { %124 = dma.vmem_to_hbm [thread:$0]  %s120_s1, 16, %s122_s21, [#allocation3]  }
 0x141   :  { %169 = dma.done.wait [#allocation3], 16  }
 0x142   :  { %170 = vsyncadd [#allocation3], 4294967280 }
 0x143   :  { %129 = vsyncpa [#allocation3], 1 }

</bundles_post_ra>
